<compile_context>
chip_gen: v5e
topology: v5e:2x2
jax: 0.10.0
libtpu: 0.0.40
codegen_flags: <defaults>
</compile_context>

<pallas_src>
import functools

import jax
import jax.numpy as jnp
from jax import lax
from jax.experimental import pallas as pl
from jax.experimental.pallas import tpu as pltpu

H_DIM = 128
NZ = 8

LANE = 128      # TPU lane width
CHUNK = 256     # in-kernel column chunk (multiple of 128; [128, 256] f32 = 32 vregs)


def _round_up(n, m):
    return ((n + m - 1) // m) * m


def _disc_kernel(x_ref, w1_ref, b1_ref, w2_ref, b2_ref, o_ref, *, chunk):
    # x_ref : [NZ, TILE]    (batch on the lane axis)
    # w1_ref: [H_DIM, NZ]   (torch layout), b1_ref: [H_DIM, 1]
    # w2_ref: [1, H_DIM]    (torch layout), b2_ref: SMEM (1, 1)
    # o_ref : [1, TILE]
    w1 = w1_ref[...]
    b1 = b1_ref[...]
    w2 = w2_ref[...]
    b2 = b2_ref[0, 0]

    n_chunks = o_ref.shape[1] // chunk  # static

    def body(c, carry):
        off = pl.multiple_of(c * chunk, chunk)
        xc = x_ref[:, pl.ds(off, chunk)]                                   # [NZ, C]
        h = jnp.dot(w1, xc, preferred_element_type=jnp.float32)           # [H, C]
        h = jnp.maximum(h + b1, 0.0)                                      # bias + ReLU
        y = jnp.dot(w2, h, preferred_element_type=jnp.float32)            # [1, C]
        o_ref[:, pl.ds(off, chunk)] = jax.nn.sigmoid(y + b2).astype(o_ref.dtype)
        return carry

    # Fully unrolled: keeps each [H, chunk] hidden chunk register-resident and
    # gives the LLO scheduler visibility across chunks.
    lax.fori_loop(0, n_chunks, body, 0, unroll=True)


@functools.partial(jax.jit, static_argnames=("tb",))
def discriminator_forward(x, w1, b1, w2, b2, *, tb=8192):
    """x: [B, NZ] f32. Weights in PyTorch layout: w1 [H_DIM, NZ], b1 [H_DIM],
    w2 [1, H_DIM], b2 [1]. Returns [B, 1] f32."""
    B = x.shape[0]

    # --- batch tile selection ---
    # Multiple of 128, capped at tb; also capped at ~B/2 so the parallel grid
    # has >=2 steps at moderate B (v7x megacore).  Forced to a multiple of
    # CHUNK so the in-kernel chunk loop divides the tile exactly.
    tile = min(tb, _round_up(max((B + 1) // 2, 1), LANE))
    if tile > CHUNK:
        tile = _round_up(tile, CHUNK)
    chunk = min(CHUNK, tile)

    # --- layout: batch on lanes ---
    # TODO(synk): keep activations feature-major ([NZ, B]) upstream to avoid this transpose copy.
    x_t = x.T                                        # [NZ, B]
    if B < tile:
        # Tiny batches: pad up to one tile (cheap).  For B >= tile we rely on
        # Pallas block clipping of the ragged last tile instead of a pad copy.
        x_t = jnp.pad(x_t, ((0, 0), (0, tile - B)))
    Bc = x_t.shape[1]
    grid = (pl.cdiv(Bc, tile),)

    b1_2d = b1.reshape(H_DIM, 1)
    b2_2d = b2.reshape(1, 1)

    kernel = functools.partial(_disc_kernel, chunk=chunk)

    y_t = pl.pallas_call(
        kernel,
        out_shape=jax.ShapeDtypeStruct((1, Bc), jnp.float32),
        grid_spec=pltpu.PrefetchScalarGridSpec(
            num_scalar_prefetch=0,
            grid=grid,
            in_specs=[
                pl.BlockSpec((NZ, tile), lambda i: (0, i)),         # x tile (batch on lanes)
                pl.BlockSpec((H_DIM, NZ), lambda i: (0, 0)),        # W1, VMEM-resident
                pl.BlockSpec((H_DIM, 1), lambda i: (0, 0)),         # b1, VMEM-resident
                pl.BlockSpec((1, H_DIM), lambda i: (0, 0)),         # W2, VMEM-resident
                pl.BlockSpec(memory_space=pltpu.MemorySpace.SMEM),  # b2 scalar
            ],
            out_specs=pl.BlockSpec((1, tile), lambda i: (0, i)),
        ),
        compiler_params=pltpu.CompilerParams(
            dimension_semantics=("parallel",),       # shard batch tiles across TCs (v7x)
            vmem_limit_bytes=32 * 1024 * 1024,       # safe on v5e/v6e/v7x; usage ~1.5 MiB
        ),
        cost_estimate=pl.CostEstimate(
            flops=2 * Bc * (NZ * H_DIM + H_DIM),
            transcendentals=Bc,
            bytes_accessed=4 * (Bc * NZ + Bc + NZ * H_DIM + 2 * H_DIM + 1),
        ),
    )(x_t, w1, b1_2d, w2, b2_2d)

    # [1, Bc] -> drop padding / clipped tail -> [B, 1]
    return y_t[:, :B].reshape(B, 1)


def init_params(key):
    """Deterministic init matching PyTorch nn.Linear defaults (torch layout)."""
    k1, k2, k3, k4 = jax.random.split(key, 4)
    bound1 = 1.0 / jnp.sqrt(NZ)
    bound2 = 1.0 / jnp.sqrt(H_DIM)
    w1 = jax.random.uniform(k1, (H_DIM, NZ), jnp.float32, -bound1, bound1)
    b1 = jax.random.uniform(k2, (H_DIM,), jnp.float32, -bound1, bound1)
    w2 = jax.random.uniform(k3, (1, H_DIM), jnp.float32, -bound2, bound2)
    b2 = jax.random.uniform(k4, (1,), jnp.float32, -bound2, bound2)
    return w1, b1, w2, b2


if __name__ == "__main__":
    key = jax.random.PRNGKey(0)
    pkey, xkey = jax.random.split(key)
    w1, b1, w2, b2 = init_params(pkey)

    B = 8  # small batch
    x = jax.random.normal(xkey, (B, NZ), jnp.float32)

    out = discriminator_forward(x, w1, b1, w2, b2)
    out = jax.block_until_ready(out)

    # Pure-JAX reference (same torch-layout weights).
    h_ref = jnp.maximum(x @ w1.T + b1, 0.0)
    ref = jax.nn.sigmoid(h_ref @ w2.T + b2)

    assert out.shape == (B, 1)
    assert jnp.allclose(out, ref, atol=1e-5, rtol=1e-5)

    print("KERNEL_OK")
</pallas_src>

<mosaic_0001>
module attributes {stable_mosaic.version = 11 : i64} {
  func.func @_disc_kernel(%arg0: i32, %arg1: memref<8x128xf32, #tpu.memory_space<vmem>>, %arg2: memref<128x8xf32, #tpu.memory_space<vmem>>, %arg3: memref<128x1xf32, #tpu.memory_space<vmem>>, %arg4: memref<1x128xf32, #tpu.memory_space<vmem>>, %arg5: memref<1x1xf32, #tpu.memory_space<smem>>, %arg6: memref<1x128xf32, #tpu.memory_space<vmem>>) attributes {dimension_semantics = [#tpu.dimension_semantics<parallel>], iteration_bounds = array<i64: 1>, scalar_prefetch = 0 : i64, scratch_operands = 0 : i64, tpu.core_type = #tpu.core_type<tc>, window_params = [{transform_indices = @transform_0, window_bounds = array<i64: 8, 128>}, {pipeline_mode = #tpu.pipeline_mode<synchronous>, transform_indices = @transform_1, window_bounds = array<i64: 128, 8>}, {pipeline_mode = #tpu.pipeline_mode<synchronous>, transform_indices = @transform_2, window_bounds = array<i64: 128, 1>}, {pipeline_mode = #tpu.pipeline_mode<synchronous>, transform_indices = @transform_3, window_bounds = array<i64: 1, 128>}, {transform_indices = @transform_4, window_bounds = array<i64: 1, 1>}, {transform_indices = @transform_5, window_bounds = array<i64: 1, 128>}]} {
    %c0 = arith.constant 0 : index
    %c0_0 = arith.constant 0 : index
    %0 = vector.load %arg2[%c0, %c0_0] : memref<128x8xf32, #tpu.memory_space<vmem>>, vector<128x8xf32>
    %c0_1 = arith.constant 0 : index
    %c0_2 = arith.constant 0 : index
    %1 = vector.load %arg3[%c0_1, %c0_2] : memref<128x1xf32, #tpu.memory_space<vmem>>, vector<128x1xf32>
    %c0_3 = arith.constant 0 : index
    %c0_4 = arith.constant 0 : index
    %2 = vector.load %arg4[%c0_3, %c0_4] : memref<1x128xf32, #tpu.memory_space<vmem>>, vector<1x128xf32>
    %c0_5 = arith.constant 0 : index
    %c0_6 = arith.constant 0 : index
    %3 = memref.load %arg5[%c0_5, %c0_6] : memref<1x1xf32, #tpu.memory_space<smem>>
    %c0_i32 = arith.constant 0 : i32
    %c128_i32 = arith.constant 128 : i32
    %4 = arith.muli %c0_i32, %c128_i32 : i32
    %5 = tpu.assume_multiple %4, 128 : i32
    %c0_7 = arith.constant 0 : index
    %6 = arith.index_cast %5 : i32 to index
    %7 = vector.load %arg1[%c0_7, %6] : memref<8x128xf32, #tpu.memory_space<vmem>>, vector<8x128xf32>
    %cst = arith.constant dense<0.000000e+00> : vector<128x128xf32>
    %8 = tpu.matmul %0, %7, %cst {dimension_numbers = #tpu.dot_dimension_numbers<[1], [0], [0], [1], [0, 0, 1, 1], [], []>} : vector<128x8xf32>, vector<8x128xf32>, vector<128x128xf32> -> vector<128x128xf32>
    %9 = vector.broadcast %1 : vector<128x1xf32> to vector<128x128xf32>
    %10 = arith.addf %8, %9 : vector<128x128xf32>
    %cst_8 = arith.constant 0.000000e+00 : f32
    %11 = vector.broadcast %cst_8 : f32 to vector<128x128xf32>
    %12 = arith.maximumf %10, %11 : vector<128x128xf32>
    %cst_9 = arith.constant dense<0.000000e+00> : vector<1x128xf32>
    %13 = tpu.matmul %2, %12, %cst_9 {dimension_numbers = #tpu.dot_dimension_numbers<[1], [0], [0], [1], [0, 0, 1, 1], [], []>} : vector<1x128xf32>, vector<128x128xf32>, vector<1x128xf32> -> vector<1x128xf32>
    %14 = vector.broadcast %3 : f32 to vector<1x128xf32>
    %15 = arith.addf %13, %14 : vector<1x128xf32>
    %16 = arith.negf %15 : vector<1x128xf32>
    %17 = math.exp %16 : vector<1x128xf32>
    %cst_10 = arith.constant 1.000000e+00 : f32
    %18 = vector.broadcast %cst_10 : f32 to vector<1x128xf32>
    %19 = arith.addf %18, %17 : vector<1x128xf32>
    %20 = arith.divf %18, %19 : vector<1x128xf32>
    %c0_11 = arith.constant 0 : index
    %21 = arith.index_cast %5 : i32 to index
    %22 = vector.load %arg6[%c0_11, %21] : memref<1x128xf32, #tpu.memory_space<vmem>>, vector<1x128xf32>
    tpu.vector_store %arg6[%c0_11, %21], %20 {strides = array<i32>} : memref<1x128xf32, #tpu.memory_space<vmem>>, vector<1x128xf32>,
    %c1_i32 = arith.constant 1 : i32
    return
  }
  func.func @transform_0(%arg0: i32) -> (i32, i32) {
    %c0_i32 = arith.constant 0 : i32
    %c0_i32_0 = arith.constant 0 : i32
    return %c0_i32, %arg0 : i32, i32
  }
  func.func @transform_1(%arg0: i32) -> (i32, i32) {
    %c0_i32 = arith.constant 0 : i32
    %c0_i32_0 = arith.constant 0 : i32
    %c0_i32_1 = arith.constant 0 : i32
    return %c0_i32, %c0_i32_0 : i32, i32
  }
  func.func @transform_2(%arg0: i32) -> (i32, i32) {
    %c0_i32 = arith.constant 0 : i32
    %c0_i32_0 = arith.constant 0 : i32
    %c0_i32_1 = arith.constant 0 : i32
    return %c0_i32, %c0_i32_0 : i32, i32
  }
  func.func @transform_3(%arg0: i32) -> (i32, i32) {
    %c0_i32 = arith.constant 0 : i32
    %c0_i32_0 = arith.constant 0 : i32
    %c0_i32_1 = arith.constant 0 : i32
    return %c0_i32, %c0_i32_0 : i32, i32
  }
  func.func @transform_4(%arg0: i32) -> (i32, i32) {
    %c0_i32 = arith.constant 0 : i32
    %c0_i32_0 = arith.constant 0 : i32
    %c0_i32_1 = arith.constant 0 : i32
    return %c0_i32, %c0_i32_0 : i32, i32
  }
  func.func @transform_5(%arg0: i32) -> (i32, i32) {
    %c0_i32 = arith.constant 0 : i32
    %c0_i32_0 = arith.constant 0 : i32
    return %c0_i32, %arg0 : i32, i32
  }
}

</mosaic_0001>

<bundles_post_ra>
// kernel: discriminator_forward.1
= control target key start
LH: loop header
LB: loop body
LE: loop exit
PB: predicated region body
PF: predicated region fallthrough
CT: control target
= control target key end

     0   :  { %v338_v0 = vmov 0   ;;  %vm136_vm0 = vcmask 64512   ;;  %s499_s2 = inlined_call_operand.vmem [shape: f32[128,1], index: 2, kind: input, shape index: {}]   ;;  %s500_s0 = inlined_call_operand.vmem [shape: f32[8,128], index: 0, kind: input, shape index: {}]   ;;  %s501_s1 = inlined_call_operand.vmem [shape: f32[128,8], index: 1, kind: input, shape index: {}]   ;;  %s502_s3 = inlined_call_operand.vmem [shape: f32[1,128], index: 3, kind: input, shape index: {}]   ;;  %s503_s4 = inlined_call_operand.<no memory space> [shape: f32[1,1], index: 4, kind: input, shape index: {}]   ;;  %s504_s5 = inlined_call_operand.vmem [shape: f32[1,128], index: 5, kind: output, shape index: {}]  }
   0x1   :  { %331 = vset.pattern.permute.xlu0 %v338_v0  ;;  %v52_v1 = vld [vmem:[%s499_s2 + $0x78] sm:$0xff]  ;;  %v55_v2 = vld [vmem:[%s500_s0] sm:$0xff]  ;;  %332 = vset.pattern.permute.xlu1 %v338_v0  ;;  %v27_v4 = vld [vmem:[%s501_s1 + $0x30] sm:$0xff] }
   0x2   :  { %v21_v3 = vld [vmem:[%s501_s1] sm:$0xff]  ;;  %133 = vperm.xlu0 %331, %v52_v1   ;;  %200 = vmatpush.msra.mxu0 %v55_v2  ;;  %v50_v6 = vld [vmem:[%s499_s2 + $0x68] sm:$0xff]  ;;  %v51_v7 = vld [vmem:[%s499_s2 + $0x70] sm:$0xff] }
   0x3   :  { %v33_v5 = vld [vmem:[%s501_s1 + $0x60] sm:$0xff]  ;;  %328 = vmatpush.msra.mxu2 %v55_v2  ;;  %329 = vmatpush.msra.mxu3 %v55_v2  ;;  %v48_v8 = vld [vmem:[%s499_s2 + $0x58] sm:$0xff]  ;;  %v22_v9 = vld [vmem:[%s501_s1 + $0x8] sm:$0xff] }
   0x4   :  { %311 = vmatmul.msk.f32.vlgmr.msra.gmra.mxu0 %vm136_vm0, %v21_v3  ;;  %317 = vmatmul.msk.f32.vlgmr.msra.gmra.mxu2 %vm136_vm0, %v27_v4  ;;  %v28_v10 = vld [vmem:[%s501_s1 + $0x38] sm:$0xff]  ;;  %v34_v11 = vld [vmem:[%s501_s1 + $0x68] sm:$0xff]  ;;  %v49_v12 = vld [vmem:[%s499_s2 + $0x60] sm:$0xff] }
   0x5   :  { %323 = vmatmul.msk.f32.vlgmr.msra.gmra.mxu3 %vm136_vm0, %v33_v5  ;;  %123 = vperm.xlu1 %332, %v50_v6   ;;  %v47_v13 = vld [vmem:[%s499_s2 + $0x50] sm:$0xff]  ;;  %v46_v14 = vld [vmem:[%s499_s2 + $0x48] sm:$0xff]  ;;  %v29_v16 = vld [vmem:[%s501_s1 + $0x40] sm:$0xff] }
   0x6   :  { %333 = vset.pattern.permute.xlu2 %v338_v0  ;;  %v23_v15 = vld [vmem:[%s501_s1 + $0x10] sm:$0xff]  ;;  %v45_v18 = vld [vmem:[%s499_s2 + $0x40] sm:$0xff]  ;;  %v44_v19 = vld [vmem:[%s499_s2 + $0x38] sm:$0xff] }
   0x7   :  { %113 = vperm.xlu2 %333, %v48_v8   ;;  %v35_v17 = vld [vmem:[%s501_s1 + $0x70] sm:$0xff]  ;;  %v24_v21 = vld [vmem:[%s501_s1 + $0x18] sm:$0xff]  ;;  %v30_v22 = vld [vmem:[%s501_s1 + $0x48] sm:$0xff] }
   0x8   :  { %v43_v20 = vld [vmem:[%s499_s2 + $0x30] sm:$0xff]  ;;  %v36_v23 = vld [vmem:[%s501_s1 + $0x78] sm:$0xff]  ;;  %v42_v24 = vld [vmem:[%s499_s2 + $0x28] sm:$0xff] }
   0x9   :  { %v41_v25 = vld [vmem:[%s499_s2 + $0x20] sm:$0xff]  ;;  %v40_v26 = vld [vmem:[%s499_s2 + $0x18] sm:$0xff]  ;;  %v31_v28 = vld [vmem:[%s501_s1 + $0x50] sm:$0xff] }
   0xa   :  { %128 = vperm.xlu0 %331, %v51_v7   ;;  %v25_v27 = vld [vmem:[%s501_s1 + $0x20] sm:$0xff]  ;;  %v39_v29 = vld [vmem:[%s499_s2 + $0x10] sm:$0xff]  ;;  %v38_v30 = vld [vmem:[%s499_s2 + $0x8] sm:$0xff] }
   0xb   :  { %v37_v31 = vld [vmem:[%s499_s2] sm:$0xff]  ;;  %v26_v32 = vld [vmem:[%s501_s1 + $0x28] sm:$0xff]  ;;  %v32_v33 = vld [vmem:[%s501_s1 + $0x58] sm:$0xff] }
   0xc   :  { %312 = vmatmul.msk.f32.gmra.mxu0 %vm136_vm0, %v22_v9  ;;  %318 = vmatmul.msk.f32.gmra.mxu2 %vm136_vm0, %v28_v10 }
   0xd   :  { %324 = vmatmul.msk.f32.gmra.mxu3 %vm136_vm0, %v34_v11  ;;  %118 = vperm.xlu1 %332, %v49_v12  }
   0xf   :  { %108 = vperm.xlu2 %333, %v47_v13  }
  0x12   :  { %103 = vperm.xlu0 %331, %v46_v14  }
  0x14   :  { %313 = vmatmul.msk.f32.gmra.mxu0 %vm136_vm0, %v23_v15  ;;  %319 = vmatmul.msk.f32.gmra.mxu2 %vm136_vm0, %v29_v16 }
  0x15   :  { %325 = vmatmul.msk.f32.gmra.mxu3 %vm136_vm0, %v35_v17  ;;  %98 = vperm.xlu1 %332, %v45_v18  }
  0x17   :  { %93 = vperm.xlu2 %333, %v44_v19  }
  0x1a   :  { %88 = vperm.xlu0 %331, %v43_v20  }
  0x1c   :  { %314 = vmatmul.msk.f32.gmra.mxu0 %vm136_vm0, %v24_v21  ;;  %320 = vmatmul.msk.f32.gmra.mxu2 %vm136_vm0, %v30_v22 }
  0x1d   :  { %326 = vmatmul.msk.f32.gmra.mxu3 %vm136_vm0, %v36_v23  ;;  %83 = vperm.xlu1 %332, %v42_v24  }
  0x1f   :  { %78 = vperm.xlu2 %333, %v41_v25  }
  0x22   :  { %73 = vperm.xlu0 %331, %v40_v26  }
  0x24   :  { %315 = vmatmul.msk.f32.gmra.mxu0 %vm136_vm0, %v25_v27  ;;  %321 = vmatmul.msk.f32.gmra.mxu2 %vm136_vm0, %v31_v28 }
  0x25   :  { %68 = vperm.xlu1 %332, %v39_v29  }
  0x27   :  { %63 = vperm.xlu2 %333, %v38_v30  }
  0x2a   :  { %58 = vperm.xlu0 %331, %v37_v31  }
  0x2c   :  { %316 = vmatmul.msk.f32.gmra.mxu0 %vm136_vm0, %v26_v32  ;;  %322 = vmatmul.msk.f32.gmra.mxu2 %vm136_vm0, %v32_v33 }
  0x61   :  { %v114_v42 = vpop.permute.xlu2 %113 }
  0x69   :  { %v109_v50 = vpop.permute.xlu2 %108 }
  0x71   :  { %v94_v63 = vpop.permute.xlu2 %93 }
  0x74   :  { %v134_v37 = vpop.permute.xlu0 %133 }
  0x77   :  { %v124_v41 = vpop.permute.xlu1 %123 }
  0x79   :  { %v79_v10 = vpop.permute.xlu2 %78 }
  0x7c   :  { %v129_v45 = vpop.permute.xlu0 %128 }
  0x7f   :  { %v119_v47 = vpop.permute.xlu1 %118 }
  0x81   :  { %v484_v34 = vpop.f32.mrf.mxu0  ;;  %v64_v24 = vpop.permute.xlu2 %63 }
  0x84   :  { %v104_v53 = vpop.permute.xlu0 %103 }
  0x87   :  { %v220_v35 = vpop.f32.mrf.mxu2  ;;  %v99_v62 = vpop.permute.xlu1 %98 }
  0x88   :  { %v238_v36 = vpop.f32.mrf.mxu3 }
  0x89   :  { %v486_v38 = vpop.f32.mrf.mxu0  ;;  %v239_v57 = vadd.f32 %v238_v36, %v119_v47  ;;  %v266_v36 = vstv %s503_s4 }
  0x8a   :  { %v206_v29 = vadd.f32 %v486_v38, %v64_v24 }
  0x8b   :  { %v262_v61 = vmax.f32 %v239_v57, 0.0 }
  0x8c   :  { %v89_v0 = vpop.permute.xlu0 %88  ;;  %v251_v32 = vmax.f32 %v206_v29, 0.0 }
  0x8d   :  { %v221_v15 = vadd.f32 %v220_v35, %v89_v0  ;;  %v53_v35 = vld [vmem:[%s502_s3] sm:$0x1] }
  0x8f   :  { %v223_v39 = vpop.f32.mrf.mxu2  ;;  %v84_v7 = vpop.permute.xlu1 %83  ;;  %v256_v19 = vmax.f32 %v221_v15, 0.0 }
  0x90   :  { %v241_v40 = vpop.f32.mrf.mxu3  ;;  %v224_v11 = vadd.f32 %v223_v39, %v94_v63 }
  0x91   :  { %v208_v46 = vpop.f32.mrf.mxu0  ;;  %v242_v54 = vadd.f32 %v241_v40, %v124_v41 }
  0x92   :  { %v257_v17 = vmax.f32 %v224_v11, 0.0 }
  0x93   :  { %v263_v59 = vmax.f32 %v242_v54, 0.0 }
  0x94   :  { %v74_v13 = vpop.permute.xlu0 %73 }
  0x97   :  { %v226_v43 = vpop.f32.mrf.mxu2  ;;  %v69_v21 = vpop.permute.xlu1 %68 }
  0x98   :  { %v244_v44 = vpop.f32.mrf.mxu3  ;;  %v227_v8 = vadd.f32 %v226_v43, %v99_v62  ;;  %v209_v25 = vadd.f32 %v208_v46, %v69_v21 }
  0x99   :  { %v245_v51 = vadd.f32 %v244_v44, %v129_v45  ;;  %v211_v55 = vpop.f32.mrf.mxu0 }
  0x9a   :  { %v258_v16 = vmax.f32 %v227_v8, 0.0  ;;  %v212_v22 = vadd.f32 %v211_v55, %v74_v13  ;;  %v252_v31 = vmax.f32 %v209_v25, 0.0 }
  0x9b   :  { %v264_v58 = vmax.f32 %v245_v51, 0.0 }
  0x9c   :  { %v59_v27 = vpop.permute.xlu0 %58  ;;  %v253_v28 = vmax.f32 %v212_v22, 0.0 }
  0x9d   :  { %v203_v30 = vadd.f32 %v484_v34, %v59_v27 }
  0x9f   :  { %v229_v48 = vpop.f32.mrf.mxu2  ;;  %v250_v33 = vmax.f32 %v203_v30, 0.0 }
  0xa0   :  { %v247_v49 = vpop.f32.mrf.mxu3  ;;  %v230_v5 = vadd.f32 %v229_v48, %v104_v53 }
  0xa1   :  { %v248_v52 = vadd.f32 %v247_v49, %v134_v37  ;;  %v214_v1 = vpop.f32.mrf.mxu0 }
  0xa2   :  { %v259_v12 = vmax.f32 %v230_v5, 0.0  ;;  %v215_v20 = vadd.f32 %v214_v1, %v79_v10 }
  0xa3   :  { %v265_v56 = vmax.f32 %v248_v52, 0.0 }
  0xa4   :  { %v254_v26 = vmax.f32 %v215_v20, 0.0 }
  0xa5   :  { %267 = vmatpush.msra.mxu1 %v265_v56 }
  0xa7   :  { %268 = vmatpush.msra.mxu1 %v264_v58  ;;  %v232_v60 = vpop.f32.mrf.mxu2 }
  0xa8   :  { %v233_v3 = vadd.f32 %v232_v60, %v109_v50 }
  0xa9   :  { %269 = vmatpush.msra.mxu1 %v263_v59  ;;  %v217_v14 = vpop.f32.mrf.mxu0 }
  0xaa   :  { %v260_v9 = vmax.f32 %v233_v3, 0.0  ;;  %v218_v18 = vadd.f32 %v217_v14, %v84_v7 }
  0xab   :  { %270 = vmatpush.msra.mxu1 %v262_v61 }
  0xac   :  { %v255_v23 = vmax.f32 %v218_v18, 0.0 }
  0xaf   :  { %v235_v2 = vpop.f32.mrf.mxu2 }
  0xb0   :  { %v236_v4 = vadd.f32 %v235_v2, %v114_v42 }
  0xb2   :  { %v261_v6 = vmax.f32 %v236_v4, 0.0 }
  0xb4   :  { %271 = vmatpush.msra.mxu1 %v261_v6 }
  0xb6   :  { %272 = vmatpush.msra.mxu1 %v260_v9 }
  0xb8   :  { %273 = vmatpush.msra.mxu1 %v259_v12 }
  0xba   :  { %274 = vmatpush.msra.mxu1 %v258_v16 }
  0xbc   :  { %275 = vmatpush.msra.mxu1 %v257_v17 }
  0xbe   :  { %276 = vmatpush.msra.mxu1 %v256_v19 }
  0xc0   :  { %277 = vmatpush.msra.mxu1 %v255_v23 }
  0xc2   :  { %278 = vmatpush.msra.mxu1 %v254_v26 }
  0xc4   :  { %279 = vmatpush.msra.mxu1 %v253_v28 }
  0xc6   :  { %280 = vmatpush.msra.mxu1 %v252_v31 }
  0xc8   :  { %281 = vmatpush.msra.mxu1 %v251_v32 }
  0xca   :  { %282 = vmatpush.msra.mxu1 %v250_v33 }
  0xcb   :  { %283 = vmatmul.f32.vlgmr.msra.gmra.mxu1 %v53_v35 }
 0x148   :  { %v284_v37 = vpop.f32.mrf.mxu1 }
 0x149   :  { %v285_v38 = vadd.f32 %v284_v37, %v266_v36 }
 0x14b   :  { %v327_v39 = vmul.f32 -1.442695, %v285_v38 }
 0x14d   :  { %334 = vpow2.f32 %v327_v39 }
 0x153   :  { %v335_v34 = vpop.eup %334 }
 0x154   :  { %v290_v40 = vadd.f32 1.0, %v335_v34 }
 0x156   :  { %336 = vrcp.f32 %v290_v40  ;;  %v302_v44 = vand.u32 2147483648, %v290_v40  ;;  %v300_v46 = vand.u32 2147483647, %v290_v40  ;;  %vm296_vm2 = vweird.f32 %v290_v40 }
 0x158   :  { %v303_v48 = vor.u32 1.1754944e-38, %v302_v44  ;;  %vm301_vm4 = vcmp.eq.f32.partialorder %v300_v46, 8.507059e+37 }
 0x15c   :  { %v337_v41 = vpop.eup %336 }
 0x15d   :  { %v292_v42 = vmul.f32 %v337_v41, %v290_v40  ;;  %vm297_vm1 = vweird.f32 %v337_v41 }
 0x15e   :  { %vm298_vm3 = vmor %vm296_vm2, %vm297_vm1 }
 0x15f   :  { %v293_v43 = vsub.f32 1.0, %v292_v42 }
 0x161   :  { %v294_v45 = vmul.f32 %v337_v41, %v293_v43 }
 0x163   :  { %v295_v47 = vadd.f32 %v337_v41, %v294_v45 }
 0x165   :  { %v299_v49 = vsel %vm298_vm3, %v337_v41, %v295_v47 }
 0x166   :  { %v304_v50 = vsel %vm301_vm4, %v303_v48, %v299_v49 }
 0x167   :  { %306 = vst [vmem:[%s504_s5] sm:$0x1] %v304_v50 }

</bundles_post_ra>
